<compile_context>
chip_gen: v5e
topology: v5e:2x2
jax: 0.10.0
libtpu: 0.0.40
codegen_flags: <defaults>
</compile_context>

<pallas_src>
import functools

import jax
import jax.numpy as jnp
from jax.experimental import pallas as pl
from jax.experimental.pallas import tpu as pltpu


def _fused_mlp_kernel(*refs, n_layers):
    # refs = (x_ref, w1, b1, w2, b2, ..., wn, bn, o_ref)
    x_ref = refs[0]           # (in_dim, TB)   batch on lanes
    o_ref = refs[-1]          # (out_dim, TB)  lane-dense output
    wb = refs[1:-1]

    h = x_ref[...]            # stays on-chip for the whole fused stack
    for i in range(n_layers):
        w = wb[2 * i][...]            # (out, in)  -- original PyTorch layout
        b = wb[2 * i + 1][...]        # (out, 1)   -- broadcasts along lanes
        # MXU matmul contracts over features; N = TB keeps all lanes busy.
        # Cast only the dot operands (bf16 option); accumulate + bias in f32.
        y = jnp.dot(w, h.astype(w.dtype), preferred_element_type=jnp.float32) + b
        h = jax.nn.sigmoid(y) if i == n_layers - 1 else jnp.maximum(y, 0.0)
    o_ref[...] = h.astype(o_ref.dtype)


def _round_up(x, m):
    return ((x + m - 1) // m) * m


def mlp_forward(x, params, *, batch_tile=8192, matmul_dtype=jnp.float32):
    """Fused MLP.forward: ReLU on hidden layers, Sigmoid on the last layer.

    x:      (B, in_dim) float32
    params: list of (w, b) with PyTorch nn.Linear layout w=(out, in), b=(out,).
    matmul_dtype: optionally jnp.bfloat16 on v6e/v7x (dot operands only).
    """
    B, in_dim = x.shape
    n = len(params)

    # Keep PyTorch (out, in) weight layout; biases as (out, 1) lane-broadcast columns.
    ws = [jnp.asarray(w) for (w, _) in params]
    bs = [jnp.asarray(b).reshape(-1, 1).astype(jnp.float32) for (_, b) in params]
    assert ws[0].shape[1] == in_dim
    out_dim = ws[-1].shape[0]

    # Batch on the lane axis.
    xt = jnp.transpose(x)                                  # (in_dim, B)
    if matmul_dtype != jnp.float32:
        xt = xt.astype(matmul_dtype)
        ws = [w.astype(matmul_dtype) for w in ws]

    # Batch tiling: lane tiles must be multiples of 128 unless they span the
    # full batch.  Prefer >=2 grid steps so the "parallel" axis actually gives
    # both v7x TensorCores work; no padded copy of x is ever materialized.
    max_tile = max(128, (batch_tile // 128) * 128)
    if B <= 256:
        TB = B                                             # single full-extent tile
    elif B <= 2 * max_tile:
        TB = min(max_tile, _round_up(pl.cdiv(B, 2), 128))  # ~2 lane-aligned tiles
    else:
        TB = max_tile
    grid = (pl.cdiv(B, TB),)

    in_specs = [pl.BlockSpec((in_dim, TB), lambda i: (0, i))]
    operands = [xt]
    for w, b in zip(ws, bs):
        # Constant index_map -> weights/biases stay VMEM-resident across grid steps.
        in_specs.append(pl.BlockSpec(w.shape, lambda i: (0, 0)))
        in_specs.append(pl.BlockSpec(b.shape, lambda i: (0, 0)))
        operands.append(w)
        operands.append(b)

    out_t = pl.pallas_call(
        functools.partial(_fused_mlp_kernel, n_layers=n),
        out_shape=jax.ShapeDtypeStruct((out_dim, B), jnp.float32),
        grid=grid,
        in_specs=in_specs,
        out_specs=pl.BlockSpec((out_dim, TB), lambda i: (0, i)),
        compiler_params=pltpu.CompilerParams(dimension_semantics=("parallel",)),
    )(*operands)

    return jnp.transpose(out_t)                            # (B, out_dim)


def init_mlp_params(key, layers):
    """Parameter init matching the PyTorch module's shapes.

    Weights: xavier_uniform_ (bound = sqrt(6/(fan_in+fan_out)))
    Biases : PyTorch nn.Linear default  U(-1/sqrt(fan_in), 1/sqrt(fan_in))
    """
    params = []
    for (_in, _out) in zip(layers[:-1], layers[1:]):
        key, kw, kb = jax.random.split(key, 3)
        w_bound = jnp.sqrt(6.0 / (_in + _out))
        w = jax.random.uniform(kw, (_out, _in), jnp.float32, -w_bound, w_bound)
        b_bound = 1.0 / jnp.sqrt(float(_in))
        b = jax.random.uniform(kb, (_out,), jnp.float32, -b_bound, b_bound)
        params.append((w, b))
    return params


def mlp_reference(x, params):
    n = len(params)
    for i, (w, b) in enumerate(params):
        y = x @ w.T + b
        x = jax.nn.sigmoid(y) if i == n - 1 else jnp.maximum(y, 0.0)
    return x


if __name__ == "__main__":
    key = jax.random.PRNGKey(0)

    layers = [16, 32, 32, 1]   # density estimation MLP: 16 -> 32 -> 32 -> 1

    key, kp = jax.random.split(key)
    params = init_mlp_params(kp, layers)

    # Small single-tile case (matches the module's typical tiny batches).
    key, kx = jax.random.split(key)
    x_small = jax.random.normal(kx, (8, layers[0]), dtype=jnp.float32)
    out_small = jax.block_until_ready(mlp_forward(x_small, params))
    ref_small = mlp_reference(x_small, params)
    assert out_small.shape == (8, layers[-1])
    assert jnp.allclose(out_small, ref_small, atol=1e-5, rtol=1e-5), "small-batch mismatch"

    # Multi-tile + ragged-last-block case (exercises the lane-tiled grid path).
    key, kx2 = jax.random.split(key)
    x_big = jax.random.normal(kx2, (300, layers[0]), dtype=jnp.float32)
    out_big = jax.block_until_ready(mlp_forward(x_big, params, batch_tile=256))
    ref_big = mlp_reference(x_big, params)
    assert out_big.shape == (300, layers[-1])
    assert jnp.allclose(out_big, ref_big, atol=1e-5, rtol=1e-5), "tiled-batch mismatch"

    print("KERNEL_OK")
</pallas_src>

<mosaic_0001>
module attributes {stable_mosaic.version = 11 : i64} {
  func.func @_fused_mlp_kernel(%arg0: i32, %arg1: memref<16x8xf32, #tpu.memory_space<vmem>>, %arg2: memref<32x16xf32, #tpu.memory_space<vmem>>, %arg3: memref<32x1xf32, #tpu.memory_space<vmem>>, %arg4: memref<32x32xf32, #tpu.memory_space<vmem>>, %arg5: memref<32x1xf32, #tpu.memory_space<vmem>>, %arg6: memref<1x32xf32, #tpu.memory_space<vmem>>, %arg7: memref<1x1xf32, #tpu.memory_space<vmem>>, %arg8: memref<1x8xf32, #tpu.memory_space<vmem>>) attributes {dimension_semantics = [#tpu.dimension_semantics<parallel>], iteration_bounds = array<i64: 1>, scalar_prefetch = 0 : i64, scratch_operands = 0 : i64, tpu.core_type = #tpu.core_type<tc>, window_params = [{transform_indices = @transform_0, window_bounds = array<i64: 16, 8>}, {pipeline_mode = #tpu.pipeline_mode<synchronous>, transform_indices = @transform_1, window_bounds = array<i64: 32, 16>}, {pipeline_mode = #tpu.pipeline_mode<synchronous>, transform_indices = @transform_2, window_bounds = array<i64: 32, 1>}, {pipeline_mode = #tpu.pipeline_mode<synchronous>, transform_indices = @transform_3, window_bounds = array<i64: 32, 32>}, {pipeline_mode = #tpu.pipeline_mode<synchronous>, transform_indices = @transform_4, window_bounds = array<i64: 32, 1>}, {pipeline_mode = #tpu.pipeline_mode<synchronous>, transform_indices = @transform_5, window_bounds = array<i64: 1, 32>}, {pipeline_mode = #tpu.pipeline_mode<synchronous>, transform_indices = @transform_6, window_bounds = array<i64: 1, 1>}, {transform_indices = @transform_7, window_bounds = array<i64: 1, 8>}]} {
    %c0 = arith.constant 0 : index
    %c0_0 = arith.constant 0 : index
    %0 = vector.load %arg1[%c0, %c0_0] : memref<16x8xf32, #tpu.memory_space<vmem>>, vector<16x8xf32>
    %c0_1 = arith.constant 0 : index
    %c0_2 = arith.constant 0 : index
    %1 = vector.load %arg2[%c0_1, %c0_2] : memref<32x16xf32, #tpu.memory_space<vmem>>, vector<32x16xf32>
    %c0_3 = arith.constant 0 : index
    %c0_4 = arith.constant 0 : index
    %2 = vector.load %arg3[%c0_3, %c0_4] : memref<32x1xf32, #tpu.memory_space<vmem>>, vector<32x1xf32>
    %cst = arith.constant dense<0.000000e+00> : vector<32x8xf32>
    %3 = tpu.matmul %1, %0, %cst {dimension_numbers = #tpu.dot_dimension_numbers<[1], [0], [0], [1], [0, 0, 1, 1], [], []>} : vector<32x16xf32>, vector<16x8xf32>, vector<32x8xf32> -> vector<32x8xf32>
    %4 = vector.broadcast %2 : vector<32x1xf32> to vector<32x8xf32>
    %5 = arith.addf %3, %4 : vector<32x8xf32>
    %cst_5 = arith.constant 0.000000e+00 : f32
    %6 = vector.broadcast %cst_5 : f32 to vector<32x8xf32>
    %7 = arith.maximumf %5, %6 : vector<32x8xf32>
    %c0_6 = arith.constant 0 : index
    %c0_7 = arith.constant 0 : index
    %8 = vector.load %arg4[%c0_6, %c0_7] : memref<32x32xf32, #tpu.memory_space<vmem>>, vector<32x32xf32>
    %c0_8 = arith.constant 0 : index
    %c0_9 = arith.constant 0 : index
    %9 = vector.load %arg5[%c0_8, %c0_9] : memref<32x1xf32, #tpu.memory_space<vmem>>, vector<32x1xf32>
    %cst_10 = arith.constant dense<0.000000e+00> : vector<32x8xf32>
    %10 = tpu.matmul %8, %7, %cst_10 {dimension_numbers = #tpu.dot_dimension_numbers<[1], [0], [0], [1], [0, 0, 1, 1], [], []>} : vector<32x32xf32>, vector<32x8xf32>, vector<32x8xf32> -> vector<32x8xf32>
    %11 = vector.broadcast %9 : vector<32x1xf32> to vector<32x8xf32>
    %12 = arith.addf %10, %11 : vector<32x8xf32>
    %cst_11 = arith.constant 0.000000e+00 : f32
    %13 = vector.broadcast %cst_11 : f32 to vector<32x8xf32>
    %14 = arith.maximumf %12, %13 : vector<32x8xf32>
    %c0_12 = arith.constant 0 : index
    %c0_13 = arith.constant 0 : index
    %15 = vector.load %arg6[%c0_12, %c0_13] : memref<1x32xf32, #tpu.memory_space<vmem>>, vector<1x32xf32>
    %c0_14 = arith.constant 0 : index
    %c0_15 = arith.constant 0 : index
    %16 = vector.load %arg7[%c0_14, %c0_15] : memref<1x1xf32, #tpu.memory_space<vmem>>, vector<1x1xf32>
    %cst_16 = arith.constant dense<0.000000e+00> : vector<1x8xf32>
    %17 = tpu.matmul %15, %14, %cst_16 {dimension_numbers = #tpu.dot_dimension_numbers<[1], [0], [0], [1], [0, 0, 1, 1], [], []>} : vector<1x32xf32>, vector<32x8xf32>, vector<1x8xf32> -> vector<1x8xf32>
    %18 = vector.broadcast %16 : vector<1x1xf32> to vector<1x8xf32>
    %19 = arith.addf %17, %18 : vector<1x8xf32>
    %20 = arith.negf %19 : vector<1x8xf32>
    %21 = math.exp %20 : vector<1x8xf32>
    %cst_17 = arith.constant 1.000000e+00 : f32
    %22 = vector.broadcast %cst_17 : f32 to vector<1x8xf32>
    %23 = arith.addf %22, %21 : vector<1x8xf32>
    %24 = arith.divf %22, %23 : vector<1x8xf32>
    %c0_18 = arith.constant 0 : index
    %c0_19 = arith.constant 0 : index
    %25 = vector.load %arg8[%c0_18, %c0_19] : memref<1x8xf32, #tpu.memory_space<vmem>>, vector<1x8xf32>
    tpu.vector_store %arg8[%c0_18, %c0_19], %24 {strides = array<i32>} : memref<1x8xf32, #tpu.memory_space<vmem>>, vector<1x8xf32>,
    return
  }
  func.func @transform_0(%arg0: i32) -> (i32, i32) {
    %c0_i32 = arith.constant 0 : i32
    %c0_i32_0 = arith.constant 0 : i32
    return %c0_i32, %arg0 : i32, i32
  }
  func.func @transform_1(%arg0: i32) -> (i32, i32) {
    %c0_i32 = arith.constant 0 : i32
    %c0_i32_0 = arith.constant 0 : i32
    %c0_i32_1 = arith.constant 0 : i32
    return %c0_i32, %c0_i32_0 : i32, i32
  }
  func.func @transform_2(%arg0: i32) -> (i32, i32) {
    %c0_i32 = arith.constant 0 : i32
    %c0_i32_0 = arith.constant 0 : i32
    %c0_i32_1 = arith.constant 0 : i32
    return %c0_i32, %c0_i32_0 : i32, i32
  }
  func.func @transform_3(%arg0: i32) -> (i32, i32) {
    %c0_i32 = arith.constant 0 : i32
    %c0_i32_0 = arith.constant 0 : i32
    %c0_i32_1 = arith.constant 0 : i32
    return %c0_i32, %c0_i32_0 : i32, i32
  }
  func.func @transform_4(%arg0: i32) -> (i32, i32) {
    %c0_i32 = arith.constant 0 : i32
    %c0_i32_0 = arith.constant 0 : i32
    %c0_i32_1 = arith.constant 0 : i32
    return %c0_i32, %c0_i32_0 : i32, i32
  }
  func.func @transform_5(%arg0: i32) -> (i32, i32) {
    %c0_i32 = arith.constant 0 : i32
    %c0_i32_0 = arith.constant 0 : i32
    %c0_i32_1 = arith.constant 0 : i32
    return %c0_i32, %c0_i32_0 : i32, i32
  }
  func.func @transform_6(%arg0: i32) -> (i32, i32) {
    %c0_i32 = arith.constant 0 : i32
    %c0_i32_0 = arith.constant 0 : i32
    %c0_i32_1 = arith.constant 0 : i32
    return %c0_i32, %c0_i32_0 : i32, i32
  }
  func.func @transform_7(%arg0: i32) -> (i32, i32) {
    %c0_i32 = arith.constant 0 : i32
    %c0_i32_0 = arith.constant 0 : i32
    return %c0_i32, %arg0 : i32, i32
  }
}

</mosaic_0001>

<bundles_post_ra>
// kernel: tpu_custom_call.1
= control target key start
LH: loop header
LB: loop body
LE: loop exit
PB: predicated region body
PF: predicated region fallthrough
CT: control target
= control target key end

     0   :  { %s416_s0 = inlined_call_operand.vmem [shape: f32[16,8], index: 0, kind: input, shape index: {}]   ;;  %s417_s1 = inlined_call_operand.vmem [shape: f32[32,16], index: 1, kind: input, shape index: {}]   ;;  %s418_s2 = inlined_call_operand.vmem [shape: f32[32,1], index: 2, kind: input, shape index: {}]   ;;  %s419_s3 = inlined_call_operand.vmem [shape: f32[32,32], index: 3, kind: input, shape index: {}]   ;;  %s420_s4 = inlined_call_operand.vmem [shape: f32[32,1], index: 4, kind: input, shape index: {}]   ;;  %s421_s5 = inlined_call_operand.vmem [shape: f32[1,32], index: 5, kind: input, shape index: {}]   ;;  %s422_s6 = inlined_call_operand.<no memory space> [shape: f32[1,1], index: 6, kind: input, shape index: {}]   ;;  %s423_s7 = inlined_call_operand.hbm [shape: f32[1,8], index: 7, kind: output, shape index: {}]  }
   0x1   :  { %v12_v0 = vstv %s422_s6 }
   0x2   :  { %13 = vst [vmem:[#allocation2] sm:$0x1] %v12_v0 }
   0x3   :  { %v30_v1 = vld [vmem:[%s416_s0 + $0x8] sm:$0xff]  ;;  %v29_v2 = vld [vmem:[%s416_s0] sm:$0xff]  ;;  %vm59_vm0 = vcmask 130048   ;;  %v302_v4 = vmov 0   ;;  %v38_v5 = vld [vmem:[%s418_s2 + $0x18] sm:$0xff] }
   0x4   :  { %86 = vmatpush.msra.mxu0 %v30_v1  ;;  %v31_v3 = vld [vmem:[%s417_s1] sm:$0xff]  ;;  %270 = vset.pattern.permute.xlu1 %v302_v4  ;;  %v36_v6 = vld [vmem:[%s418_s2 + $0x8] sm:$0xff]  ;;  %v34_v7 = vld [vmem:[%s417_s1 + $0x18] sm:$0xff] }
   0x5   :  { %269 = vset.pattern.permute.xlu0 %v302_v4  ;;  %46 = vperm.xlu1 %270, %v36_v6  }
   0x6   :  { %87 = vmatpush.msra.mxu0 %v29_v2  ;;  %56 = vperm.xlu0 %269, %v38_v5  }
   0x7   :  { %247 = vmatmul.msk.f32.vlgmr.msra.gmra.mxu0 %vm59_vm0, %v31_v3  ;;  %257 = vmatpush.msra.mxu1 %v30_v1 }
   0x8   :  { %14 = vsyncpa [#allocation4], 0  ;;  %271 = vset.pattern.permute.xlu2 %v302_v4  ;;  %v35_v8 = vld [vmem:[%s418_s2] sm:$0xff]  ;;  %v37_v9 = vld [vmem:[%s418_s2 + $0x10] sm:$0xff]  ;;  %vm133_vm1 = vcmask 261120   ;;  %s238_s13 = sshll.u32 %s423_s7, 4  ;;  %s239_s13 = int_to_ptr.hbm [resolvable:$true] %s238_s13 }
   0x9   :  { %258 = vmatpush.msra.mxu1 %v29_v2  ;;  %v32_v10 = vld [vmem:[%s417_s1 + $0x8] sm:$0xff]  ;;  %v109_v11 = vld [vmem:[%s420_s4] sm:$0xff]  ;;  %v33_v13 = vld [vmem:[%s417_s1 + $0x10] sm:$0xff]  ;;  %vm229_vm5 = vcmask 57344  }
   0xa   :  { %250 = vmatmul.msk.f32.vlgmr.msra.gmra.mxu1 %vm59_vm0, %v34_v7  ;;  %v110_v12 = vld [vmem:[%s420_s4 + $0x8] sm:$0xff]  ;;  %v112_v17 = vld [vmem:[%s420_s4 + $0x18] sm:$0xff]  ;;  %v111_v22 = vld [vmem:[%s420_s4 + $0x10] sm:$0xff] }
   0xb   :  { %130 = vperm.xlu2 %271, %v112_v17   ;;  %v180_v28 = vld [vmem:[#allocation2] sm:$0x1]  ;;  %v106_v34 = vld [vmem:[%s419_s3 + $0x8] sm:$0xff]  ;;  %v107_v35 = vld [vmem:[%s419_s3 + $0x10] sm:$0xff] }
   0xc   :  { %v105_v33 = vld [vmem:[%s419_s3] sm:$0xff]  ;;  %v108_v36 = vld [vmem:[%s419_s3 + $0x18] sm:$0xff] }
   0xd   :  { %41 = vperm.xlu1 %270, %v35_v8   ;;  %v179_v53 = vld [vmem:[%s421_s5] sm:$0x1]  ;;  %s303_s5 = smov [#allocation3]  }
   0xe   :  { %51 = vperm.xlu0 %269, %v37_v9   ;;  %s236_s11 = sshll.u32 %s303_s5, 4  ;;  %s237_s11 = int_to_ptr.vmem [resolvable:$true] %s236_s11 }
   0xf   :  { %248 = vmatmul.msk.f32.gmra.mxu0 %vm59_vm0, %v32_v10 }
  0x13   :  { %125 = vperm.xlu2 %271, %v111_v22  }
  0x15   :  { %115 = vperm.xlu1 %270, %v109_v11  }
  0x16   :  { %120 = vperm.xlu0 %269, %v110_v12  }
  0x17   :  { %249 = vmatmul.msk.f32.gmra.mxu0 %vm59_vm0, %v33_v13 }
  0x1b   :  { %183 = vperm.xlu2 %271, %v180_v28  }
  0x65   :  { %v131_v37 = vpop.permute.xlu2 %130 }
  0x6d   :  { %v126_v39 = vpop.permute.xlu2 %125 }
  0x75   :  { %v184_v54 = vpop.permute.xlu2 %183 }
  0x76   :  { %v186_v55 = vperm.slane %v184_v54, 0 }
  0x77   :  { %v47_v19 = vpop.permute.xlu1 %46 }
  0x78   :  { %v57_v15 = vpop.permute.xlu0 %56 }
  0x7f   :  { %v42_v23 = vpop.permute.xlu1 %41 }
  0x80   :  { %v52_v24 = vpop.permute.xlu0 %51 }
  0x84   :  { %v89_v14 = vpop.f32.mrf.mxu0 }
  0x85   :  { %v90_v29 = vadd.f32 %v89_v14, %v42_v23 }
  0x87   :  { %v98_v16 = vpop.f32.mrf.mxu1  ;;  %v101_v32 = vmax.f32 %v90_v29, 0.0  ;;  %v116_v48 = vpop.permute.xlu1 %115 }
  0x88   :  { %v99_v18 = vadd.f32 %v98_v16, %v57_v15  ;;  %v121_v44 = vpop.permute.xlu0 %120 }
  0x8a   :  { %v104_v20 = vmax.f32 %v99_v18, 0.0 }
  0x8c   :  { %v92_v21 = vpop.f32.mrf.mxu0  ;;  %158 = vmatpush.msrb.mxu1 %v104_v20  ;;  %259 = vmatpush.msra.mxu2 %v104_v20 }
  0x8d   :  { %260 = vmatpush.msra.mxu3 %v104_v20  ;;  %v93_v26 = vadd.f32 %v92_v21, %v47_v19 }
  0x8f   :  { %v102_v31 = vmax.f32 %v93_v26, 0.0 }
  0x94   :  { %v95_v25 = vpop.f32.mrf.mxu0 }
  0x95   :  { %v96_v27 = vadd.f32 %v95_v25, %v52_v24 }
  0x97   :  { %v103_v30 = vmax.f32 %v96_v27, 0.0 }
  0x99   :  { %159 = vmatpush.msrb.mxu1 %v103_v30  ;;  %261 = vmatpush.msra.mxu2 %v103_v30 }
  0x9a   :  { %262 = vmatpush.msra.mxu3 %v103_v30 }
  0x9b   :  { %160 = vmatpush.msrb.mxu1 %v102_v31  ;;  %263 = vmatpush.msra.mxu2 %v102_v31 }
  0x9c   :  { %264 = vmatpush.msra.mxu3 %v102_v31 }
  0x9d   :  { %161 = vmatpush.msrb.mxu1 %v101_v32  ;;  %265 = vmatpush.msra.mxu2 %v101_v32 }
  0x9e   :  { %266 = vmatpush.msra.mxu3 %v101_v32  ;;  %251 = vmatmul.msk.f32.vlgmr.msrb.gmra.mxu1 %vm133_vm1, %v105_v33 }
  0x9f   :  { %252 = vmatmul.msk.f32.vlgmr.msra.gmra.mxu2 %vm133_vm1, %v106_v34  ;;  %253 = vmatmul.msk.f32.vlgmr.msra.gmra.mxu3 %vm133_vm1, %v107_v35 }
  0xa7   :  { %254 = vmatmul.msk.f32.gmra.mxu3 %vm133_vm1, %v108_v36 }
 0x11b   :  { %v163_v45 = vpop.f32.mrf.mxu1 }
 0x11c   :  { %v164_v49 = vadd.f32 %v163_v45, %v116_v48 }
 0x11e   :  { %v175_v52 = vmax.f32 %v164_v49, 0.0 }
 0x122   :  { %v169_v38 = vpop.f32.mrf.mxu3  ;;  %v166_v40 = vpop.f32.mrf.mxu2 }
 0x123   :  { %v170_v42 = vadd.f32 %v169_v38, %v126_v39  ;;  %v167_v46 = vadd.f32 %v166_v40, %v121_v44 }
 0x125   :  { %v177_v50 = vmax.f32 %v170_v42, 0.0  ;;  %v176_v51 = vmax.f32 %v167_v46, 0.0 }
 0x12a   :  { %v172_v41 = vpop.f32.mrf.mxu3 }
 0x12b   :  { %v173_v43 = vadd.f32 %v172_v41, %v131_v37 }
 0x12d   :  { %v178_v47 = vmax.f32 %v173_v43, 0.0 }
 0x12f   :  { %202 = vmatpush.msrb.mxu2 %v178_v47 }
 0x131   :  { %203 = vmatpush.msrb.mxu2 %v177_v50 }
 0x133   :  { %204 = vmatpush.msrb.mxu2 %v176_v51 }
 0x135   :  { %205 = vmatpush.msrb.mxu2 %v175_v52 }
 0x136   :  { %255 = vmatmul.msk.f32.vlgmr.msrb.gmra.mxu2 %vm133_vm1, %v179_v53 }
 0x1b9   :  { %v207_v56 = vpop.f32.mrf.mxu2 }
 0x1ba   :  { %v208_v57 = vadd.f32 %v207_v56, %v186_v55 }
 0x1bc   :  { %v256_v58 = vmul.f32 -1.442695, %v208_v57 }
 0x1be   :  { %272 = vpow2.f32 %v256_v58 }
 0x1c4   :  { %v273_v59 = vpop.eup %272 }
 0x1c5   :  { %v213_v60 = vadd.f32 1.0, %v273_v59 }
 0x1c7   :  { %274 = vrcp.f32 %v213_v60  ;;  %v225_v0 = vand.u32 2147483648, %v213_v60  ;;  %v223_v2 = vand.u32 2147483647, %v213_v60  ;;  %vm219_vm3 = vweird.f32 %v213_v60 }
 0x1c9   :  { %v226_v4 = vor.u32 1.1754944e-38, %v225_v0  ;;  %vm224_vm6 = vcmp.eq.f32.partialorder %v223_v2, 8.507059e+37 }
 0x1cd   :  { %v275_v61 = vpop.eup %274 }
 0x1ce   :  { %v215_v62 = vmul.f32 %v275_v61, %v213_v60  ;;  %vm220_vm2 = vweird.f32 %v275_v61 }
 0x1cf   :  { %vm221_vm4 = vmor %vm219_vm3, %vm220_vm2 }
 0x1d0   :  { %v216_v63 = vsub.f32 1.0, %v215_v62 }
 0x1d2   :  { %v217_v1 = vmul.f32 %v275_v61, %v216_v63 }
 0x1d4   :  { %v218_v3 = vadd.f32 %v275_v61, %v217_v1 }
 0x1d6   :  { %v222_v5 = vsel %vm221_vm4, %v275_v61, %v218_v3 }
 0x1d7   :  { %v227_v6 = vsel %vm224_vm6, %v226_v4, %v222_v5 }
 0x1d8   :  { %230 = vst.msk [vmem:[#allocation3] sm:$0x1] %vm229_vm5, %v227_v6 }
 0x1d9   :  { %241 = dma.vmem_to_hbm [thread:$0]  %s237_s11, 16, %s239_s13, [#allocation4]  }
 0x1da   :  { %300 = dma.done.wait [#allocation4], 16  }
 0x1db   :  { %301 = vsyncadd [#allocation4], 4294967280 }
 0x1dc   :  { %246 = vsyncpa [#allocation4], 1 }

</bundles_post_ra>
